<compile_context>
chip_gen: v7x
topology: tpu7x:2x2x1
jax: 0.10.0
libtpu: 0.0.40
codegen_flags: <defaults>
</compile_context>

<pallas_src>
import jax
import jax.numpy as jnp
from jax.experimental import pallas as pl
from jax.experimental.pallas import tpu as pltpu


def _round_up(x, m):
    return (x + m - 1) // m * m


def cbow_forward(indices, emb_table, w_t, bias, *, block_v=512):
    """indices: (C,) int; emb_table: (V, E); w_t: (E, V); bias: (V,). -> (V,)"""
    C = int(indices.shape[0])
    V, E = emb_table.shape
    assert w_t.shape == (E, V) and bias.shape == (V,)

    # Pad E (zeros: exact math) and V (bias -1e30: padded lanes vanish in
    # log_softmax) to keep every block lane-dense and (8,128)-friendly.
    E_pad = _round_up(E, 128)
    TV = _round_up(min(block_v, _round_up(V, 128)), 128)   # V tile, mult of 128
    V_pad = _round_up(V, TV)
    nV = V_pad // TV

    emb_p = jnp.pad(emb_table, ((0, 0), (0, E_pad - E)))
    w_p = jnp.pad(w_t, ((0, E_pad - E), (0, V_pad - V)))
    b_p = jnp.pad(bias.astype(jnp.float32).reshape(1, V),
                  ((0, 0), (0, V_pad - V)), constant_values=-1e30)
    idx = indices.astype(jnp.int32)

    def kernel(idx_ref, emb_hbm, w_ref, b_ref, out_ref, rows, h_ref, sems):
        j = pl.program_id(0)

        # --- step 0: gather the C context rows (overlapped DMAs) and sum ---
        @pl.when(j == 0)
        def _():
            for c in range(C):  # start all gathers before the first wait
                pltpu.make_async_copy(
                    emb_hbm.at[pl.ds(idx_ref[c], 1), :],
                    rows.at[pl.ds(c, 1), :],
                    sems.at[c]).start()
            for c in range(C):
                pltpu.make_async_copy(
                    emb_hbm.at[pl.ds(idx_ref[c], 1), :],
                    rows.at[pl.ds(c, 1), :],
                    sems.at[c]).wait()
            h_ref[...] = jnp.sum(rows[...].astype(jnp.float32), axis=0,
                                 keepdims=True)                       # (1, E)

        # --- every step: one V tile of the linear layer on the MXU ---------
        logits_tile = jnp.dot(h_ref[...], w_ref[...],
                              preferred_element_type=jnp.float32)
        logits_tile = logits_tile + b_ref[...].astype(jnp.float32)    # (1, TV)
        out_ref[j] = logits_tile.astype(out_ref.dtype)

        # --- last step: stable log_softmax over the full resident logits ---
        @pl.when(j == nV - 1)
        def _():
            logits = out_ref[...].astype(jnp.float32)        # (nV, 1, TV)
            shifted = logits - jnp.max(logits)
            lse = jnp.log(jnp.sum(jnp.exp(shifted)))
            out_ref[...] = (shifted - lse).astype(out_ref.dtype)

    out = pl.pallas_call(
        kernel,
        out_shape=jax.ShapeDtypeStruct((nV, 1, TV), jnp.float32),
        grid_spec=pltpu.PrefetchScalarGridSpec(
            num_scalar_prefetch=1,          # context-word indices -> SMEM
            grid=(nV,),
            in_specs=[
                # Embedding table stays in HBM; rows are DMA-gathered manually.
                pl.BlockSpec(memory_space=pl.ANY),
                # Linear weight streamed over V tiles (double-buffered).
                pl.BlockSpec((E_pad, TV), lambda j, idx: (0, j)),
                # Bias tile.
                pl.BlockSpec((1, TV), lambda j, idx: (0, j)),
            ],
            # Constant-index output block: resident across the whole grid.
            out_specs=pl.BlockSpec((nV, 1, TV), lambda j, idx: (0, 0, 0)),
            scratch_shapes=[
                pltpu.VMEM((C, E_pad), emb_table.dtype),   # gathered rows
                pltpu.VMEM((1, E_pad), jnp.float32),       # summed context h
                pltpu.SemaphoreType.DMA((C,)),             # one sem per gather
            ],
        ),
        compiler_params=pltpu.CompilerParams(
            dimension_semantics=("arbitrary",)),
    )(idx, emb_p, w_p, b_p)

    return out.reshape(-1)[:V]   # (V,) to match PyTorch's 1-D output


def reference_forward(indices, emb_table, w_t, bias):
    h = emb_table[indices].sum(axis=0)      # (E,)
    logits = h @ w_t + bias                 # (V,)
    return jax.nn.log_softmax(logits)


if __name__ == "__main__":
    CONTEXT_SIZE = 2
    EMBEDDING_SIZE = 100     # module default (exercises E padding to 128)
    VOCAB_SIZE = 300         # non-aligned vocab (exercises V padding/tiling)
    C = 2 * CONTEXT_SIZE     # 4 context words

    key = jax.random.PRNGKey(0)
    k_emb, k_w, k_b, k_idx = jax.random.split(key, 4)

    emb_table = jax.random.normal(k_emb, (VOCAB_SIZE, EMBEDDING_SIZE),
                                  dtype=jnp.float32)
    # nn.Linear(E, V): weight (V, E), bias (V,). Pass weight pre-transposed.
    w = jax.random.normal(k_w, (VOCAB_SIZE, EMBEDDING_SIZE),
                          dtype=jnp.float32) * 0.05
    bias = jax.random.normal(k_b, (VOCAB_SIZE,), dtype=jnp.float32) * 0.05
    w_t = jnp.transpose(w)   # (E, V)

    indices = jax.random.randint(k_idx, (C,), 0, VOCAB_SIZE, dtype=jnp.int32)

    # block_v=128 -> 3 V tiles: exercises the streamed-weight / tiled path.
    out = cbow_forward(indices, emb_table, w_t, bias, block_v=128)
    out = jax.block_until_ready(out)

    ref = reference_forward(indices, emb_table, w_t, bias)
    assert out.shape == (VOCAB_SIZE,)
    assert jnp.allclose(out, ref, atol=1e-5, rtol=1e-5), "mismatch vs reference"

    print("KERNEL_OK")
</pallas_src>

<mosaic_0001>
module attributes {stable_mosaic.version = 11 : i64} {
  func.func @kernel(%arg0: i32, %arg1: memref<4xi32, #tpu.memory_space<smem>>, %arg2: memref<300x128xf32, #tpu.memory_space<any>>, %arg3: memref<128x128xf32, #tpu.memory_space<vmem>>, %arg4: memref<1x128xf32, #tpu.memory_space<vmem>>, %arg5: memref<3x1x128xf32, #tpu.memory_space<vmem>>, %arg6: memref<4x128xf32, #tpu.memory_space<vmem>>, %arg7: memref<1x128xf32, #tpu.memory_space<vmem>>, %arg8: memref<4x!tpu.dma_semaphore, #tpu.memory_space<semaphore_mem>>) attributes {dimension_semantics = [#tpu.dimension_semantics<arbitrary>], iteration_bounds = array<i64: 3>, scalar_prefetch = 1 : i64, scratch_operands = 3 : i64, tpu.core_type = #tpu.core_type<tc>, window_params = [{}, {transform_indices = @transform_1, window_bounds = array<i64: 128, 128>}, {transform_indices = @transform_2, window_bounds = array<i64: 1, 128>}, {pipeline_mode = #tpu.pipeline_mode<synchronous>, transform_indices = @transform_3, window_bounds = array<i64: 3, 1, 128>}]} {
    %c0_i32 = arith.constant 0 : i32
    %0 = arith.cmpi eq, %arg0, %c0_i32 : i32
    %1 = arith.extui %0 : i1 to i32
    %c0_i32_0 = arith.constant 0 : i32
    %2 = arith.cmpi ne, %1, %c0_i32_0 : i32
    scf.if %2 {
      %c0_9 = arith.constant 0 : index
      %15 = memref.load %arg1[%c0_9] : memref<4xi32, #tpu.memory_space<smem>>
      %c0_i32_10 = arith.constant 0 : i32
      %c0_i32_11 = arith.constant 0 : i32
      %16 = tpu.memref_slice %arg2[%15, %c0_i32_11] : memref<300x128xf32, #tpu.memory_space<any>> -> memref<1x128xf32, #tpu.memory_space<any>>
      %c0_i32_12 = arith.constant 0 : i32
      %c0_i32_13 = arith.constant 0 : i32
      %17 = tpu.memref_slice %arg6[%c0_i32_12, %c0_i32_13] : memref<4x128xf32, #tpu.memory_space<vmem>> -> memref<1x128xf32, #tpu.memory_space<vmem>>
      %18 = tpu.memref_slice %arg8[%c0_i32_10] : memref<4x!tpu.dma_semaphore, #tpu.memory_space<semaphore_mem>> -> memref<1x!tpu.dma_semaphore, #tpu.memory_space<semaphore_mem>>
      %19 = tpu.memref_squeeze %18 : memref<1x!tpu.dma_semaphore, #tpu.memory_space<semaphore_mem>> -> memref<!tpu.dma_semaphore, #tpu.memory_space<semaphore_mem>>
      tpu.enqueue_dma source(%16 : memref<1x128xf32, #tpu.memory_space<any>>) target(%17 : memref<1x128xf32, #tpu.memory_space<vmem>>) target_semaphore(%19 : memref<!tpu.dma_semaphore, #tpu.memory_space<semaphore_mem>>)
      %c1 = arith.constant 1 : index
      %20 = memref.load %arg1[%c1] : memref<4xi32, #tpu.memory_space<smem>>
      %c1_i32 = arith.constant 1 : i32
      %c0_i32_14 = arith.constant 0 : i32
      %21 = tpu.memref_slice %arg2[%20, %c0_i32_14] : memref<300x128xf32, #tpu.memory_space<any>> -> memref<1x128xf32, #tpu.memory_space<any>>
      %c1_i32_15 = arith.constant 1 : i32
      %c0_i32_16 = arith.constant 0 : i32
      %22 = tpu.memref_slice %arg6[%c1_i32_15, %c0_i32_16] : memref<4x128xf32, #tpu.memory_space<vmem>> -> memref<1x128xf32, #tpu.memory_space<vmem>>
      %23 = tpu.memref_slice %arg8[%c1_i32] : memref<4x!tpu.dma_semaphore, #tpu.memory_space<semaphore_mem>> -> memref<1x!tpu.dma_semaphore, #tpu.memory_space<semaphore_mem>>
      %24 = tpu.memref_squeeze %23 : memref<1x!tpu.dma_semaphore, #tpu.memory_space<semaphore_mem>> -> memref<!tpu.dma_semaphore, #tpu.memory_space<semaphore_mem>>
      tpu.enqueue_dma source(%21 : memref<1x128xf32, #tpu.memory_space<any>>) target(%22 : memref<1x128xf32, #tpu.memory_space<vmem>>) target_semaphore(%24 : memref<!tpu.dma_semaphore, #tpu.memory_space<semaphore_mem>>)
      %c2 = arith.constant 2 : index
      %25 = memref.load %arg1[%c2] : memref<4xi32, #tpu.memory_space<smem>>
      %c2_i32_17 = arith.constant 2 : i32
      %c0_i32_18 = arith.constant 0 : i32
      %26 = tpu.memref_slice %arg2[%25, %c0_i32_18] : memref<300x128xf32, #tpu.memory_space<any>> -> memref<1x128xf32, #tpu.memory_space<any>>
      %c2_i32_19 = arith.constant 2 : i32
      %c0_i32_20 = arith.constant 0 : i32
      %27 = tpu.memref_slice %arg6[%c2_i32_19, %c0_i32_20] : memref<4x128xf32, #tpu.memory_space<vmem>> -> memref<1x128xf32, #tpu.memory_space<vmem>>
      %28 = tpu.memref_slice %arg8[%c2_i32_17] : memref<4x!tpu.dma_semaphore, #tpu.memory_space<semaphore_mem>> -> memref<1x!tpu.dma_semaphore, #tpu.memory_space<semaphore_mem>>
      %29 = tpu.memref_squeeze %28 : memref<1x!tpu.dma_semaphore, #tpu.memory_space<semaphore_mem>> -> memref<!tpu.dma_semaphore, #tpu.memory_space<semaphore_mem>>
      tpu.enqueue_dma source(%26 : memref<1x128xf32, #tpu.memory_space<any>>) target(%27 : memref<1x128xf32, #tpu.memory_space<vmem>>) target_semaphore(%29 : memref<!tpu.dma_semaphore, #tpu.memory_space<semaphore_mem>>)
      %c3 = arith.constant 3 : index
      %30 = memref.load %arg1[%c3] : memref<4xi32, #tpu.memory_space<smem>>
      %c3_i32 = arith.constant 3 : i32
      %c0_i32_21 = arith.constant 0 : i32
      %31 = tpu.memref_slice %arg2[%30, %c0_i32_21] : memref<300x128xf32, #tpu.memory_space<any>> -> memref<1x128xf32, #tpu.memory_space<any>>
      %c3_i32_22 = arith.constant 3 : i32
      %c0_i32_23 = arith.constant 0 : i32
      %32 = tpu.memref_slice %arg6[%c3_i32_22, %c0_i32_23] : memref<4x128xf32, #tpu.memory_space<vmem>> -> memref<1x128xf32, #tpu.memory_space<vmem>>
      %33 = tpu.memref_slice %arg8[%c3_i32] : memref<4x!tpu.dma_semaphore, #tpu.memory_space<semaphore_mem>> -> memref<1x!tpu.dma_semaphore, #tpu.memory_space<semaphore_mem>>
      %34 = tpu.memref_squeeze %33 : memref<1x!tpu.dma_semaphore, #tpu.memory_space<semaphore_mem>> -> memref<!tpu.dma_semaphore, #tpu.memory_space<semaphore_mem>>
      tpu.enqueue_dma source(%31 : memref<1x128xf32, #tpu.memory_space<any>>) target(%32 : memref<1x128xf32, #tpu.memory_space<vmem>>) target_semaphore(%34 : memref<!tpu.dma_semaphore, #tpu.memory_space<semaphore_mem>>)
      %c0_24 = arith.constant 0 : index
      %35 = memref.load %arg1[%c0_24] : memref<4xi32, #tpu.memory_space<smem>>
      %c0_i32_25 = arith.constant 0 : i32
      %c0_i32_26 = arith.constant 0 : i32
      %36 = tpu.memref_slice %arg2[%35, %c0_i32_26] : memref<300x128xf32, #tpu.memory_space<any>> -> memref<1x128xf32, #tpu.memory_space<any>>
      %c0_i32_27 = arith.constant 0 : i32
      %c0_i32_28 = arith.constant 0 : i32
      %37 = tpu.memref_slice %arg6[%c0_i32_27, %c0_i32_28] : memref<4x128xf32, #tpu.memory_space<vmem>> -> memref<1x128xf32, #tpu.memory_space<vmem>>
      %38 = tpu.memref_slice %arg8[%c0_i32_25] : memref<4x!tpu.dma_semaphore, #tpu.memory_space<semaphore_mem>> -> memref<1x!tpu.dma_semaphore, #tpu.memory_space<semaphore_mem>>
      %39 = tpu.memref_squeeze %38 : memref<1x!tpu.dma_semaphore, #tpu.memory_space<semaphore_mem>> -> memref<!tpu.dma_semaphore, #tpu.memory_space<semaphore_mem>>
      tpu.wait_dma2 semaphore(%39 : memref<!tpu.dma_semaphore, #tpu.memory_space<semaphore_mem>>) src(%36 : memref<1x128xf32, #tpu.memory_space<any>>) dst(%37 : memref<1x128xf32, #tpu.memory_space<vmem>>)
      %c1_29 = arith.constant 1 : index
      %40 = memref.load %arg1[%c1_29] : memref<4xi32, #tpu.memory_space<smem>>
      %c1_i32_30 = arith.constant 1 : i32
      %c0_i32_31 = arith.constant 0 : i32
      %41 = tpu.memref_slice %arg2[%40, %c0_i32_31] : memref<300x128xf32, #tpu.memory_space<any>> -> memref<1x128xf32, #tpu.memory_space<any>>
      %c1_i32_32 = arith.constant 1 : i32
      %c0_i32_33 = arith.constant 0 : i32
      %42 = tpu.memref_slice %arg6[%c1_i32_32, %c0_i32_33] : memref<4x128xf32, #tpu.memory_space<vmem>> -> memref<1x128xf32, #tpu.memory_space<vmem>>
      %43 = tpu.memref_slice %arg8[%c1_i32_30] : memref<4x!tpu.dma_semaphore, #tpu.memory_space<semaphore_mem>> -> memref<1x!tpu.dma_semaphore, #tpu.memory_space<semaphore_mem>>
      %44 = tpu.memref_squeeze %43 : memref<1x!tpu.dma_semaphore, #tpu.memory_space<semaphore_mem>> -> memref<!tpu.dma_semaphore, #tpu.memory_space<semaphore_mem>>
      tpu.wait_dma2 semaphore(%44 : memref<!tpu.dma_semaphore, #tpu.memory_space<semaphore_mem>>) src(%41 : memref<1x128xf32, #tpu.memory_space<any>>) dst(%42 : memref<1x128xf32, #tpu.memory_space<vmem>>)
      %c2_34 = arith.constant 2 : index
      %45 = memref.load %arg1[%c2_34] : memref<4xi32, #tpu.memory_space<smem>>
      %c2_i32_35 = arith.constant 2 : i32
      %c0_i32_36 = arith.constant 0 : i32
      %46 = tpu.memref_slice %arg2[%45, %c0_i32_36] : memref<300x128xf32, #tpu.memory_space<any>> -> memref<1x128xf32, #tpu.memory_space<any>>
      %c2_i32_37 = arith.constant 2 : i32
      %c0_i32_38 = arith.constant 0 : i32
      %47 = tpu.memref_slice %arg6[%c2_i32_37, %c0_i32_38] : memref<4x128xf32, #tpu.memory_space<vmem>> -> memref<1x128xf32, #tpu.memory_space<vmem>>
      %48 = tpu.memref_slice %arg8[%c2_i32_35] : memref<4x!tpu.dma_semaphore, #tpu.memory_space<semaphore_mem>> -> memref<1x!tpu.dma_semaphore, #tpu.memory_space<semaphore_mem>>
      %49 = tpu.memref_squeeze %48 : memref<1x!tpu.dma_semaphore, #tpu.memory_space<semaphore_mem>> -> memref<!tpu.dma_semaphore, #tpu.memory_space<semaphore_mem>>
      tpu.wait_dma2 semaphore(%49 : memref<!tpu.dma_semaphore, #tpu.memory_space<semaphore_mem>>) src(%46 : memref<1x128xf32, #tpu.memory_space<any>>) dst(%47 : memref<1x128xf32, #tpu.memory_space<vmem>>)
      %c3_39 = arith.constant 3 : index
      %50 = memref.load %arg1[%c3_39] : memref<4xi32, #tpu.memory_space<smem>>
      %c3_i32_40 = arith.constant 3 : i32
      %c0_i32_41 = arith.constant 0 : i32
      %51 = tpu.memref_slice %arg2[%50, %c0_i32_41] : memref<300x128xf32, #tpu.memory_space<any>> -> memref<1x128xf32, #tpu.memory_space<any>>
      %c3_i32_42 = arith.constant 3 : i32
      %c0_i32_43 = arith.constant 0 : i32
      %52 = tpu.memref_slice %arg6[%c3_i32_42, %c0_i32_43] : memref<4x128xf32, #tpu.memory_space<vmem>> -> memref<1x128xf32, #tpu.memory_space<vmem>>
      %53 = tpu.memref_slice %arg8[%c3_i32_40] : memref<4x!tpu.dma_semaphore, #tpu.memory_space<semaphore_mem>> -> memref<1x!tpu.dma_semaphore, #tpu.memory_space<semaphore_mem>>
      %54 = tpu.memref_squeeze %53 : memref<1x!tpu.dma_semaphore, #tpu.memory_space<semaphore_mem>> -> memref<!tpu.dma_semaphore, #tpu.memory_space<semaphore_mem>>
      tpu.wait_dma2 semaphore(%54 : memref<!tpu.dma_semaphore, #tpu.memory_space<semaphore_mem>>) src(%51 : memref<1x128xf32, #tpu.memory_space<any>>) dst(%52 : memref<1x128xf32, #tpu.memory_space<vmem>>)
      %c0_44 = arith.constant 0 : index
      %c0_45 = arith.constant 0 : index
      %55 = vector.load %arg6[%c0_44, %c0_45] : memref<4x128xf32, #tpu.memory_space<vmem>>, vector<4x128xf32>
      %cst_46 = arith.constant dense<0.000000e+00> : vector<128xf32>
      %56 = vector.multi_reduction <add>, %55, %cst_46 [0] : vector<4x128xf32> to vector<128xf32>
      %57 = vector.shape_cast %56 : vector<128xf32> to vector<1x128xf32>
      %c0_47 = arith.constant 0 : index
      %c0_48 = arith.constant 0 : index
      %58 = vector.load %arg7[%c0_47, %c0_48] : memref<1x128xf32, #tpu.memory_space<vmem>>, vector<1x128xf32>
      tpu.vector_store %arg7[%c0_47, %c0_48], %57 {strides = array<i32>} : memref<1x128xf32, #tpu.memory_space<vmem>>, vector<1x128xf32>,
    } else {
    }
    %c0 = arith.constant 0 : index
    %c0_1 = arith.constant 0 : index
    %3 = vector.load %arg7[%c0, %c0_1] : memref<1x128xf32, #tpu.memory_space<vmem>>, vector<1x128xf32>
    %c0_2 = arith.constant 0 : index
    %c0_3 = arith.constant 0 : index
    %4 = vector.load %arg3[%c0_2, %c0_3] : memref<128x128xf32, #tpu.memory_space<vmem>>, vector<128x128xf32>
    %cst = arith.constant dense<0.000000e+00> : vector<1x128xf32>
    %5 = tpu.matmul %3, %4, %cst {dimension_numbers = #tpu.dot_dimension_numbers<[1], [0], [0], [1], [0, 0, 1, 1], [], []>} : vector<1x128xf32>, vector<128x128xf32>, vector<1x128xf32> -> vector<1x128xf32>
    %c0_4 = arith.constant 0 : index
    %c0_5 = arith.constant 0 : index
    %6 = vector.load %arg4[%c0_4, %c0_5] : memref<1x128xf32, #tpu.memory_space<vmem>>, vector<1x128xf32>
    %7 = arith.addf %5, %6 : vector<1x128xf32>
    %8 = arith.index_cast %arg0 : i32 to index
    %c0_6 = arith.constant 0 : index
    %c0_7 = arith.constant 0 : index
    %9 = vector.load %arg5[%8, %c0_6, %c0_7] : memref<3x1x128xf32, #tpu.memory_space<vmem>>, vector<1x1x128xf32>
    %10 = vector.shape_cast %9 : vector<1x1x128xf32> to vector<1x128xf32>
    %11 = vector.shape_cast %7 : vector<1x128xf32> to vector<1x1x128xf32>
    tpu.vector_store %arg5[%8, %c0_6, %c0_7], %11 {strides = array<i32>} : memref<3x1x128xf32, #tpu.memory_space<vmem>>, vector<1x1x128xf32>,
    %c2_i32 = arith.constant 2 : i32
    %12 = arith.cmpi eq, %arg0, %c2_i32 : i32
    %13 = arith.extui %12 : i1 to i32
    %c0_i32_8 = arith.constant 0 : i32
    %14 = arith.cmpi ne, %13, %c0_i32_8 : i32
    scf.if %14 {
      %c0_9 = arith.constant 0 : index
      %c0_10 = arith.constant 0 : index
      %c0_11 = arith.constant 0 : index
      %15 = vector.load %arg5[%c0_9, %c0_10, %c0_11] : memref<3x1x128xf32, #tpu.memory_space<vmem>>, vector<3x1x128xf32>
      %16 = vector.shape_cast %15 : vector<3x1x128xf32> to vector<1x3x1x128xf32>
      %cst_12 = arith.constant dense<0xFF800000> : vector<1xf32>
      %17 = vector.multi_reduction <maximumf>, %16, %cst_12 [1, 2, 3] : vector<1x3x1x128xf32> to vector<1xf32>
      %18 = vector.shape_cast %17 : vector<1xf32> to vector<1x1x1x1xf32>
      %19 = vector.extract %18[0, 0, 0, 0] : f32 from vector<1x1x1x1xf32>
      %20 = vector.broadcast %19 : f32 to vector<3x1x128xf32>
      %21 = arith.subf %15, %20 : vector<3x1x128xf32>
      %22 = math.exp %21 : vector<3x1x128xf32>
      %23 = vector.shape_cast %22 : vector<3x1x128xf32> to vector<1x3x1x128xf32>
      %cst_13 = arith.constant dense<0.000000e+00> : vector<1xf32>
      %24 = vector.multi_reduction <add>, %23, %cst_13 [1, 2, 3] : vector<1x3x1x128xf32> to vector<1xf32>
      %25 = vector.shape_cast %24 : vector<1xf32> to vector<1x1x1x1xf32>
      %26 = vector.extract %25[0, 0, 0, 0] : f32 from vector<1x1x1x1xf32>
      %27 = math.log %26 : f32
      %28 = vector.broadcast %27 : f32 to vector<3x1x128xf32>
      %29 = arith.subf %21, %28 : vector<3x1x128xf32>
      %c0_14 = arith.constant 0 : index
      %c0_15 = arith.constant 0 : index
      %c0_16 = arith.constant 0 : index
      %30 = vector.load %arg5[%c0_14, %c0_15, %c0_16] : memref<3x1x128xf32, #tpu.memory_space<vmem>>, vector<3x1x128xf32>
      tpu.vector_store %arg5[%c0_14, %c0_15, %c0_16], %29 {strides = array<i32>} : memref<3x1x128xf32, #tpu.memory_space<vmem>>, vector<3x1x128xf32>,
    } else {
    }
    return
  }
  func.func @transform_1(%arg0: i32, %arg1: memref<4xi32, #tpu.memory_space<smem>>) -> (i32, i32) {
    %c0_i32 = arith.constant 0 : i32
    %c0_i32_0 = arith.constant 0 : i32
    return %c0_i32, %arg0 : i32, i32
  }
  func.func @transform_2(%arg0: i32, %arg1: memref<4xi32, #tpu.memory_space<smem>>) -> (i32, i32) {
    %c0_i32 = arith.constant 0 : i32
    %c0_i32_0 = arith.constant 0 : i32
    return %c0_i32, %arg0 : i32, i32
  }
  func.func @transform_3(%arg0: i32, %arg1: memref<4xi32, #tpu.memory_space<smem>>) -> (i32, i32, i32) {
    %c0_i32 = arith.constant 0 : i32
    %c0_i32_0 = arith.constant 0 : i32
    %c0_i32_1 = arith.constant 0 : i32
    %c0_i32_2 = arith.constant 0 : i32
    return %c0_i32, %c0_i32_0, %c0_i32_1 : i32, i32, i32
  }
}

</mosaic_0001>

<bundles_post_ra>
// kernel: tpu_custom_call.1
= control target key start
LH: loop header
LB: loop body
LE: loop exit
PB: predicated region body
PF: predicated region fallthrough
CT: control target
= control target key end

     0   :  { %s1185_s0 = inlined_call_operand.hbm [shape: s32[4], index: 0, kind: input, shape index: {}]   ;;  %s1186_s1 = inlined_call_operand.hbm [shape: f32[300,128], index: 1, kind: input, shape index: {}]   ;;  %s1187_s2 = inlined_call_operand.hbm [shape: f32[128,384], index: 2, kind: input, shape index: {}]   ;;  %s1188_s3 = inlined_call_operand.vmem [shape: f32[1,384], index: 3, kind: input, shape index: {}]   ;;  %s1189_s4 = inlined_call_operand.hbm [shape: f32[3,1,128], index: 4, kind: output, shape index: {}]  }
   0x1   :  { %s686_s17 = scalar_lea.hbm %s1185_s0, 16 }
   0x2   :  { %p687_p0 = scmp.ne.s32.totalorder %s1185_s0, %s686_s17  ;;  %p690_p1 = scmp.lt.u32.totalorder %s686_s17, %s1185_s0 }
   0x4   :  { %p692_p2 = pnand %p690_p1, %p687_p0 }
   0x6   :  { %695 = shalt.err (!%p692_p2)  }
   0x7   :  { %s898_s22 = smov [#allocation6]  }
   0x8   :  { %10 = dma.hbm_to_smem %s1185_s0, 16, %s898_s22, [#allocation5] }
   0x9   :  { %864 = dma.done.wait [#allocation5], 16 }
   0xa   :  { %865 = vsyncadd [#allocation5], 4294967280 }
   0xb   :  { %12 = sfence }
   0xc   :  { %13 = vsyncpa [#allocation8], 0 }
   0xd   :  { %15 = vsyncpa [#allocation8 + $0x1], 0 }
   0xe   :  { %16 = vsyncpa [#allocation9], 0  ;;  %s950_s25 = smov 0   ;;  %s952_s26 = smov 0  }
   0xf   :  { %s954_s27 = smov 0   ;;  %s956_s28 = smov 0  }
  0x10 LB: > { %s969_s0 = sadd.s32 4294967295, %s896_s28   ;;  %s972_s29 = sadd.s32 1, %s896_s28   ;;  %s896_s28 = sphi %s956_s28, %s1196_s28   ;;  %s892_s27 = sphi %s954_s27, %s1195_s27   ;;  %s888_s26 = sphi %s952_s26, %s1194_s26   ;;  %s884_s25 = sphi %s950_s25, %s1193_s25  }
  0x11   : > { %s26_s30 = ssub.s32 %s896_s28, %s972_s29  ;;  %s29_s5 = sadd.s32 1, %s892_s27 }
  0x12   : > { %p27_p3 = scmp.eq.s32.totalorder %s26_s30, 0  ;;  %p36_p4 = scmp.ne.s32.totalorder %s892_s27, %s888_s26 }
  0x13   : > { %p37_p5 = scmp.eq.s32.totalorder %s896_s28, 0  ;;  %p42_p6 = scmp.ne.s32.totalorder %s888_s26, %s884_s25 }
  0x14   : > { %s982_s6 = scalar_select %p27_p3, %s892_s27, %s29_s5  }
  0x15   : > { %p38_p7 = por %p37_p5, %p36_p4  ;;  %p43_p8 = scmp.eq.s32.totalorder %s969_s0, 0 }
  0x16   : > { %p629_p9 = scmp.lt.s32.totalorder %s896_s28, 3  ;;  %s113_s8 = sand.u32 1, %s892_s27  }
  0x17   : > { %p986_p10 = por %p43_p8, %p42_p6  ;;  %s512_s9 = sshll.u32 %s113_s8, 7 }
  0x18   : > { %s513_s10 = sshll.u32 %s896_s28, 7  ;;  %s117_s14 = scalar_lea.vmem [#allocation7], %s512_s9 }
  0x19   : > { %s995_s13 = scalar_lea.hbm %s1187_s2, %s513_s10  ;;  %s123_s15 = sshll.u32 %s117_s14, 4  ;;  %s997_s15 = int_to_ptr.vmem [resolvable:$true] %s123_s15 }
  0x1a   : > { %p999_p11 = pnand %p629_p9, %p38_p7  ;;  %s1003_s17 = scalar_lea.sflag [#allocation8], %s113_s8 }
  0x1b   : > { %s696_s18 = scalar_lea.hbm %s995_s13, 2048  ;;  %s701_s21 = scalar_lea.hbm %s1187_s2, 6144 }
  0x1c   : > { %p697_p12 = scmp.ne.s32.totalorder %s995_s13, %s696_s18  ;;  %p698_p13 = pneg %p999_p11 }
  0x1d   : > { %p702_p2 = scmp.lt.u32.totalorder %s995_s13, %s1187_s2  ;;  %p703_p3 = scmp.lt.u32.totalorder %s701_s21, %s696_s18 }
  0x1e   : > { %p699_p0 = pnand %p698_p13, %p697_p12  ;;  %p705_p5 = scmp.lt.u32.totalorder %s696_s18, %s995_s13 }
  0x1f   : > { %p704_p4 = por %p703_p3, %p702_p2 }
  0x20   : > { %p700_p1 = pneg %p699_p0 }
  0x21   : > { %p706_p6 = por %p705_p5, %p704_p4 }
  0x23   : > { %p707_p7 = pnand %p706_p6, %p700_p1 }
  0x25   : > { %710 = shalt.err (!%p707_p7)
}
  0x26   : > { %s711_s24 = scalar_lea.vmem %s997_s15, 2048  ;;  %s899_s25 = smov [#allocation7]  }
  0x27   : > { %p712_p8 = scmp.ne.s32.totalorder %s997_s15, %s711_s24  ;;  %s716_s30 = sshll.u32 %s899_s25, 4  ;;  %s717_s30 = int_to_ptr.vmem [resolvable:$false] %s716_s30 }
  0x28   : > { %s718_s5 = scalar_lea.vmem %s717_s30, 4096  ;;  %p719_p0 = scmp.lt.s32.totalorder %s997_s15, %s717_s30 }
  0x29   : > { %p714_p9 = pnand %p712_p8, %p698_p13  ;;  %p720_p2 = scmp.lt.s32.totalorder %s718_s5, %s711_s24 }
  0x2b   : > { %p715_p12 = pneg %p714_p9  ;;  %p721_p3 = por %p720_p2, %p719_p0 }
  0x2d   : > { %p722_p4 = pnand %p721_p3, %p715_p12 }
  0x2f   : > { %725 = shalt.err (!%p722_p4)
}
  0x30   : > { %s900_s8 = smov 384   ;;  %s901_s9 = smov 128  }
  0x31   : > { %s902_s10 = smov 8   ;;  %p514_p13 = scmp.ge.s32.totalorder %s896_s28, 1 }
  0x32   : > { %628 = dma.hbm_to_vmem [thread:$0]  (!%p999_p11), %s995_s13, 2048, %s997_s15, %s1003_s17, %s900_s8, %s901_s9, %s902_s10  }
  0x33   : > { %p137_p1 = scmp.lt.s32.totalorder %s896_s28, 4 }
  0x35   : > { %p138_p5 = pnand %p514_p13, %p137_p1 }
  0x36   : > { %s143_s11 = sand.u32 (!%p138_p5), 1, %s888_s26  }
  0x37   : > { %141 = sbr.rel (%p138_p5) target bundleno = 962 (0x3c2), region = 28  ;;  %s515_s12 = sshll.u32 (!%p138_p5), %s143_s11, 7 }
  0x38   : > { %s144_s14 = scalar_lea.sflag (!%p138_p5), [#allocation8], %s143_s11  ;;  %s1034_s18 = scalar_lea.vmem (!%p138_p5), [#allocation7], %s515_s12 }
  0x3e   : > { %867 = dma.done.wait (%p986_p10), %s144_s14, 2048  }
  0x3f   : > { %869 = vsyncadd (%p986_p10), %s144_s14, 4294965248  ;;  %p166_p6 = scmp.lt.s32.totalorder %s969_s0, 2  ;;  %p516_p11 = scmp.ne.s32.totalorder %s969_s0, 0 }
  0x40   : > { %s173_s19 = sld [smem:[#allocation6]] (!%p516_p11)  ;;  %s903_s20 = smov (!%p516_p11), [#allocation2]  }
  0x41   : > { %s1042_s13 = scalar_select %p166_p6, %s969_s0, 2 }
  0x42   : > { %172 = sbr.rel (%p516_p11) target bundleno = 176 (0xb0), region = 36  ;;  %s183_s21 = sshll.u32 (!%p516_p11), %s903_s20, 4  ;;  %s1051_s21 = int_to_ptr.vmem [resolvable:$true] %s183_s21 }
  0x43   : > { %s1049_s22 = sld [smem:[#allocation6 + $0x1]] (!%p516_p11)  ;;  %s904_s7 = smov (!%p516_p11), [#allocation2 + $0x1]  }
  0x44   : > { %s199_s23 = sshll.u32 (!%p516_p11), %s904_s7, 4  ;;  %s1053_s24 = sld [smem:[#allocation6 + $0x2]] (!%p516_p11)  ;;  %s1055_s23 = int_to_ptr.vmem [resolvable:$true] %s199_s23 }
  0x45   : > { %s905_s25 = smov (!%p516_p11), [#allocation2 + $0x2]   ;;  %s1057_s5 = sld [smem:[#allocation6 + $0x3]] (!%p516_p11) }
  0x46   : > { %s215_s30 = sshll.u32 (!%p516_p11), %s905_s25, 4  ;;  %s517_s8 = sshll.u32 (!%p516_p11), %s173_s19, 4  ;;  %s1059_s30 = int_to_ptr.vmem [resolvable:$true] %s215_s30 }
  0x47   : > { %s175_s11 = scalar_lea.hbm (!%p516_p11), %s1186_s1, %s517_s8  ;;  %s1068_s20 = scalar_lea.hbm (!%p516_p11), %s1186_s1, 4864 }
  0x48   : > { %s726_s14 = scalar_lea.hbm (!%p516_p11), %s175_s11, 16  ;;  %p729_p7 = scmp.lt.u32.totalorder (!%p516_p11), %s175_s11, %s1186_s1 }
  0x49   : > { %s519_s12 = sshll.u32 %s1049_s22, 4  ;;  %p727_p10 = scmp.ne.s32.totalorder %s175_s11, %s726_s14 }
  0x4a   : > { %p730_p8 = scmp.lt.u32.totalorder %s1068_s20, %s726_s14  ;;  %p732_p12 = scmp.lt.u32.totalorder %s726_s14, %s175_s11 }
  0x4c   : > { %p731_p9 = por %p730_p8, %p729_p7 }
  0x4e   : > { %p733_p0 = por %p732_p12, %p731_p9 }
  0x50   : > { %p734_p2 = pnand %p733_p0, %p727_p10 }
  0x52   : > { %737 = shalt.err (!%p734_p2)  }
  0x53   : > { %s738_s19 = scalar_lea.vmem %s1051_s21, 16  ;;  %s1077_s22 = scalar_lea.vmem %s1051_s21, 64 }
  0x54   : > { %p739_p3 = scmp.ne.s32.totalorder %s1051_s21, %s738_s19  ;;  %p743_p4 = scmp.lt.s32.totalorder %s1051_s21, %s1051_s21 }
  0x55   : > { %p744_p13 = scmp.lt.s32.totalorder %s1077_s22, %s738_s19 }
  0x57   : > { %p745_p1 = por %p744_p13, %p743_p4 }
  0x59   : > { %p746_p5 = pnand %p745_p1, %p739_p3 }
  0x5b   : > { %749 = shalt.err (!%p746_p5)  }
  0x5c   : > { %186 = dma.hbm_to_vmem [thread:$0]  %s175_s11, 16, %s1051_s21, [#allocation4] }
  0x5d   : > { %s189_s8 = scalar_lea.hbm %s1186_s1, %s519_s12  ;;  %s521_s9 = sshll.u32 %s1053_s24, 4 }
  0x5e   : > { %s750_s10 = scalar_lea.hbm %s189_s8, 16  ;;  %p753_p11 = scmp.lt.u32.totalorder %s189_s8, %s1186_s1 }
  0x5f   : > { %p751_p6 = scmp.ne.s32.totalorder %s189_s8, %s750_s10  ;;  %p754_p10 = scmp.lt.u32.totalorder %s1068_s20, %s750_s10 }
  0x60   : > { %p756_p8 = scmp.lt.u32.totalorder %s750_s10, %s189_s8 }
  0x61   : > { %p755_p7 = por %p754_p10, %p753_p11 }
  0x63   : > { %p757_p9 = por %p756_p8, %p755_p7 }
  0x65   : > { %p758_p12 = pnand %p757_p9, %p751_p6 }
  0x67   : > { %761 = shalt.err (!%p758_p12)  }
  0x68   : > { %s762_s11 = scalar_lea.vmem %s1055_s23, 16  ;;  %p767_p2 = scmp.lt.s32.totalorder %s1055_s23, %s1051_s21 }
  0x69   : > { %p763_p0 = scmp.ne.s32.totalorder %s1055_s23, %s762_s11  ;;  %p768_p3 = scmp.lt.s32.totalorder %s1077_s22, %s762_s11 }
  0x6b   : > { %p769_p4 = por %p768_p3, %p767_p2 }
  0x6d   : > { %p770_p13 = pnand %p769_p4, %p763_p0 }
  0x6f   : > { %773 = shalt.err (!%p770_p13)  }
  0x70   : > { %202 = dma.hbm_to_vmem [thread:$0]  %s189_s8, 16, %s1055_s23, [#allocation4 + $0x1] }
  0x71   : > { %s205_s16 = scalar_lea.hbm %s1186_s1, %s521_s9  ;;  %s523_s7 = sshll.u32 %s1057_s5, 4 }
  0x72   : > { %s774_s19 = scalar_lea.hbm %s205_s16, 16  ;;  %p777_p5 = scmp.lt.u32.totalorder %s205_s16, %s1186_s1 }
  0x73   : > { %p775_p1 = scmp.ne.s32.totalorder %s205_s16, %s774_s19  ;;  %p778_p6 = scmp.lt.u32.totalorder %s1068_s20, %s774_s19 }
  0x74   : > { %p780_p10 = scmp.lt.u32.totalorder %s774_s19, %s205_s16 }
  0x75   : > { %p779_p11 = por %p778_p6, %p777_p5 }
  0x77   : > { %p781_p7 = por %p780_p10, %p779_p11 }
  0x79   : > { %p782_p8 = pnand %p781_p7, %p775_p1 }
  0x7b   : > { %785 = shalt.err (!%p782_p8)  }
  0x7c   : > { %s786_s23 = scalar_lea.vmem %s1059_s30, 16  ;;  %p791_p12 = scmp.lt.s32.totalorder %s1059_s30, %s1051_s21 }
  0x7d   : > { %p787_p9 = scmp.ne.s32.totalorder %s1059_s30, %s786_s23  ;;  %p792_p0 = scmp.lt.s32.totalorder %s1077_s22, %s786_s23 }
  0x7f   : > { %p793_p2 = por %p792_p0, %p791_p12 }
  0x81   : > { %p794_p3 = pnand %p793_p2, %p787_p9 }
  0x83   : > { %797 = shalt.err (!%p794_p3)  }
  0x84   : > { %218 = dma.hbm_to_vmem [thread:$0]  %s205_s16, 16, %s1059_s30, [#allocation4 + $0x2] }
  0x85   : > { %s221_s9 = scalar_lea.hbm %s1186_s1, %s523_s7  ;;  %s906_s10 = smov [#allocation2 + $0x3]  }
  0x86   : > { %s231_s14 = sshll.u32 %s906_s10, 4  ;;  %s798_s15 = scalar_lea.hbm %s221_s9, 16  ;;  %s232_s14 = int_to_ptr.vmem [resolvable:$true] %s231_s14 }
  0x87   : > { %p799_p4 = scmp.ne.s32.totalorder %s221_s9, %s798_s15  ;;  %p801_p13 = scmp.lt.u32.totalorder %s221_s9, %s1186_s1 }
  0x88   : > { %p802_p1 = scmp.lt.u32.totalorder %s1068_s20, %s798_s15  ;;  %p804_p6 = scmp.lt.u32.totalorder %s798_s15, %s221_s9 }
  0x8a   : > { %p803_p5 = por %p802_p1, %p801_p13 }
  0x8c   : > { %p805_p11 = por %p804_p6, %p803_p5 }
  0x8e   : > { %p806_p10 = pnand %p805_p11, %p799_p4 }
  0x90   : > { %809 = shalt.err (!%p806_p10)  }
  0x91   : > { %s810_s30 = scalar_lea.vmem %s232_s14, 16  ;;  %p815_p8 = scmp.lt.s32.totalorder %s232_s14, %s1051_s21 }
  0x92   : > { %p811_p7 = scmp.ne.s32.totalorder %s232_s14, %s810_s30  ;;  %p816_p9 = scmp.lt.s32.totalorder %s1077_s22, %s810_s30 }
  0x94   : > { %p817_p12 = por %p816_p9, %p815_p8 }
  0x96   : > { %p818_p0 = pnand %p817_p12, %p811_p7 }
  0x98   : > { %821 = shalt.err (!%p818_p0)  }
  0x99   : > { %234 = dma.hbm_to_vmem [thread:$0]  %s221_s9, 16, %s232_s14, [#allocation4 + $0x3] }
  0x9a   : > { %870 = dma.done.wait [#allocation4], 16 }
  0x9b   : > { %871 = vsyncadd [#allocation4], 4294967280 }
  0x9c   : > { %872 = dma.done.wait [#allocation4 + $0x1], 16 }
  0x9d   : > { %873 = vsyncadd [#allocation4 + $0x1], 4294967280 }
  0x9e   : > { %874 = dma.done.wait [#allocation4 + $0x2], 16 }
  0x9f   : > { %875 = vsyncadd [#allocation4 + $0x2], 4294967280 }
  0xa0   : > { %876 = dma.done.wait [#allocation4 + $0x3], 16 }
  0xa1   : > { %877 = vsyncadd [#allocation4 + $0x3], 4294967280  ;;  %vm249_vm0 = vcmask 1043456   ;;  %v248_v0 = vld [vmem:[#allocation2] sm:$0xf] }
  0xa2   : > { %v250_v1 = vsel %vm249_vm0, %v248_v0, 0.0 }
  0xa3   : > { %v251_v2 = vrot.slane %v250_v1, 4 }
  0xa5   : > { %v252_v3 = vadd.f32 %v251_v2, %v250_v1 }
  0xa7   : > { %v253_v4 = vrot.slane %v252_v3, 2 }
  0xa9   : > { %v254_v5 = vadd.f32 %v253_v4, %v252_v3 }
  0xab   : > { %v255_v6 = vrot.slane %v254_v5, 1 }
  0xad   : > { %v256_v7 = vadd.f32 %v255_v6, %v254_v5 }
  0xaf   : > { %257 = vst [vmem:[#allocation3] sm:$0x1] %v256_v7 }
  0xb0 PF: > { %v259_v8 = vld [vmem:[%s1034_s18] sm:$0xff]  ;;  %v260_v9 = vld [vmem:[%s1034_s18 + $0x8] sm:$0xff]  ;;  %v261_v10 = vld [vmem:[%s1034_s18 + $0x10] sm:$0xff]  ;;  %v907_v11 = vmov 0.0|0.0   ;;  %vm908_vm1 = vmmov 0   ;;  %v909_v14 = vmov 0.0   ;;  %s1192_s22 = scalar_lea.vmem %s1188_s3, %s1042_s13 }
  0xb1   : > { %589 = vmatprep.subr.bf16.mxu0 %v907_v11  ;;  %v590_v12 = vpack.c.bf16 %v260_v9, %v259_v8  ;;  %v262_v13 = vld [vmem:[%s1034_s18 + $0x18] sm:$0xff]  ;;  %586 = vmatprep.mubr.msk.f32.mxu0 %vm908_vm1, %v909_v14  ;;  %v263_v16 = vld [vmem:[%s1034_s18 + $0x20] sm:$0xff]  ;;  %v264_v17 = vld [vmem:[%s1034_s18 + $0x28] sm:$0xff]  ;;  %s534_s12 = scalar_lea.vmem [#allocation10], %s896_s28  ;;  %p525_p2 = scmp.ne.s32.totalorder %s969_s0, 2 }
  0xb2   : > { %v593_v15 = vpack.c.bf16 %v262_v13, %v261_v10  ;;  %v596_v18 = vpack.c.bf16 %v264_v17, %v263_v16  ;;  %v265_v19 = vld [vmem:[%s1034_s18 + $0x30] sm:$0xff]  ;;  %v266_v20 = vld [vmem:[%s1034_s18 + $0x38] sm:$0xff]  ;;  %v267_v22 = vld [vmem:[%s1034_s18 + $0x40] sm:$0xff]  ;;  %vm355_vm2 = vcmask (!%p525_p2), 1040384  }
  0xb3   : > { %591 = vmatpush3.bf16.msra.mxu0 %v590_v12  ;;  %v599_v21 = vpack.c.bf16 %v266_v20, %v265_v19  ;;  %v268_v23 = vld [vmem:[%s1034_s18 + $0x48] sm:$0xff]  ;;  %v269_v25 = vld [vmem:[%s1034_s18 + $0x50] sm:$0xff]  ;;  %v270_v26 = vld [vmem:[%s1034_s18 + $0x58] sm:$0xff] }
  0xb4   : > { %592 = vmatprep.subr.bf16.mxu0 %v907_v11  ;;  %v602_v24 = vpack.c.bf16 %v268_v23, %v267_v22  ;;  %v605_v27 = vpack.c.bf16 %v270_v26, %v269_v25  ;;  %v271_v28 = vld [vmem:[%s1034_s18 + $0x60] sm:$0xff]  ;;  %v272_v29 = vld [vmem:[%s1034_s18 + $0x68] sm:$0xff]  ;;  %v273_v31 = vld [vmem:[%s1034_s18 + $0x70] sm:$0xff] }
  0xb5   : > { %v608_v30 = vpack.c.bf16 %v272_v29, %v271_v28  ;;  %v274_v32 = vld [vmem:[%s1034_s18 + $0x78] sm:$0xff]  ;;  %v275_v35 = vld [vmem:[%s1192_s22] sm:$0x1] }
  0xb6   : > { %v611_v33 = vpack.c.bf16 %v274_v32, %v273_v31  ;;  %v258_v34 = vld [vmem:[#allocation3] sm:$0x1] }
  0xb7   : > { %594 = vmatpush3.bf16.msra.mxu0 %v593_v15 }
  0xb8   : > { %595 = vmatprep.subr.bf16.mxu0 %v907_v11 }
  0xbb   : > { %597 = vmatpush3.bf16.msra.mxu0 %v596_v18 }
  0xbc   : > { %598 = vmatprep.subr.bf16.mxu0 %v907_v11 }
  0xbf   : > { %600 = vmatpush3.bf16.msra.mxu0 %v599_v21 }
  0xc0   : > { %601 = vmatprep.subr.bf16.mxu0 %v907_v11 }
  0xc3   : > { %603 = vmatpush3.bf16.msra.mxu0 %v602_v24 }
  0xc4   : > { %604 = vmatprep.subr.bf16.mxu0 %v907_v11 }
  0xc7   : > { %606 = vmatpush3.bf16.msra.mxu0 %v605_v27 }
  0xc8   : > { %607 = vmatprep.subr.bf16.mxu0 %v907_v11 }
  0xcb   : > { %609 = vmatpush3.bf16.msra.mxu0 %v608_v30 }
  0xcc   : > { %610 = vmatprep.subr.bf16.mxu0 %v907_v11 }
  0xcf   : > { %612 = vmatpush3.bf16.msra.mxu0 %v611_v33 }
  0xd2   : > { %587 = vmatmul.mubr.f32.vlgmr.msra.gmra.mrb[0].mxu0 %v258_v34 }
 0x1a2   : > { %351 = sbr.rel (%p525_p2) target bundleno = 936 (0x3a8), region = 56 }
 0x1a5   : > { %v342_v36 = vpop.f32.mrb[0].mxu0 }
 0x1a6   : > { %v343_v37 = vadd.f32 %v342_v36, %v275_v35  ;;  %v588_v38 = vpop.f32.mrb[1].mxu0 }
 0x1a8   : > { %536 = vst [vmem:[%s534_s12 - $0x1] sm:$0x1] %v343_v37 }
 0x1af   : > { %v352_v39 = vld [vmem:[#allocation10] sm:$0x1]  ;;  %v353_v40 = vld [vmem:[#allocation10 + $0x1] sm:$0x1]  ;;  %v354_v41 = vld [vmem:[#allocation10 + $0x2] sm:$0x1] }
 0x1b0   : > { %v356_v42 = vsel %vm355_vm2, %v352_v39, -inf  ;;  %v357_v43 = vsel %vm355_vm2, %v353_v40, -inf  ;;  %v358_v44 = vsel %vm355_vm2, %v354_v41, -inf }
 0x1b1   : > { %v359_v45 = vmax.f32 %v356_v42, %v357_v43 }
 0x1b3   : > { %v360_v46 = vmax.f32 %v359_v45, %v358_v44 }
 0x1b5   : > { %361 = vmax.xlane.f32.xlu0 %v360_v46 }
 0x242   : > { %v362_v47 = vpop.xlane.xlu0 %361 }
 0x243   : > { %v363_v48 = vrot.slane %v362_v47, 4 }
 0x245   : > { %v364_v49 = vmax.f32 %v362_v47, %v363_v48 }
 0x247   : > { %v365_v50 = vrot.slane %v364_v49, 2 }
 0x249   : > { %v366_v51 = vmax.f32 %v364_v49, %v365_v50 }
 0x24b   : > { %v367_v52 = vrot.slane %v366_v51, 1 }
 0x24d   : > { %v368_v53 = vmax.f32 %v366_v51, %v367_v52 }
 0x24f   : > { %613 = vpush %v368_v53 }
 0x280   : > { %s614_s28 = spop %613 }
 0x281   : > { %v370_v54 = vstv %s614_s28 }
 0x282   : > { %v371_v55 = vsub.f32 %v352_v39, %v370_v54  ;;  %v372_v56 = vsub.f32 %v353_v40, %v370_v54  ;;  %v373_v57 = vsub.f32 %v354_v41, %v370_v54 }
 0x284   : > { %v374_v58 = vmul.f32 1.442695, %v371_v55  ;;  %v376_v59 = vmul.f32 1.442695, %v372_v56  ;;  %v378_v60 = vmul.f32 1.442695, %v373_v57 }
 0x286   : > { %678 = vpow2.f32 %v374_v58 }
 0x287   : > { %680 = vpow2.f32 %v376_v59 }
 0x288   : > { %682 = vpow2.f32 %v378_v60 }
 0x290   : > { %v679_v61 = vpop.eup %678 }
 0x291   : > { %v681_v62 = vpop.eup %680  ;;  %v380_v63 = vsel %vm355_vm2, %v679_v61, 0.0 }
 0x292   : > { %v683_v0 = vpop.eup %682  ;;  %v381_v1 = vsel %vm355_vm2, %v681_v62, 0.0 }
 0x293   : > { %v382_v2 = vadd.f32 %v381_v1, %v380_v63  ;;  %v383_v3 = vsel %vm355_vm2, %v683_v0, 0.0 }
 0x295   : > { %v384_v4 = vadd.f32 %v383_v3, %v382_v2 }
 0x297   : > { %385 = vadd.xlane.f32.xlu0 %v384_v4 }
 0x324   : > { %v386_v5 = vpop.xlane.xlu0 %385 }
 0x325   : > { %v387_v6 = vrot.slane %v386_v5, 4 }
 0x327   : > { %v388_v7 = vadd.f32 %v387_v6, %v386_v5 }
 0x329   : > { %v389_v8 = vrot.slane %v388_v7, 2 }
 0x32b   : > { %v390_v9 = vadd.f32 %v389_v8, %v388_v7 }
 0x32d   : > { %v391_v10 = vrot.slane %v390_v9, 1 }
 0x32f   : > { %v392_v11 = vadd.f32 %v391_v10, %v390_v9 }
 0x331   : > { %615 = vpush %v392_v11 }
 0x362   : > { %s616_s18 = spop %615 }
 0x363   : > { %v394_v12 = vstv %s616_s18 }
 0x364   : > { %684 = vlog2.f32 %v394_v12 }
 0x36e   : > { %v685_v13 = vpop.eup %684 }
 0x36f   : > { %v396_v14 = vmul.f32 0.6931472, %v685_v13 }
 0x371   : > { %617 = vpush %v396_v14 }
 0x3a2   : > { %s618_s13 = spop %617 }
 0x3a3   : > { %v398_v15 = vstv %s618_s13 }
 0x3a4   : > { %v399_v16 = vsub.f32 %v371_v55, %v398_v15  ;;  %v400_v17 = vsub.f32 %v372_v56, %v398_v15  ;;  %v401_v18 = vsub.f32 %v373_v57, %v398_v15 }
 0x3a6   : > { %402 = vst [vmem:[#allocation10] sm:$0x1] %v399_v16  ;;  %403 = vst [vmem:[#allocation10 + $0x1] sm:$0x1] %v400_v17 }
 0x3a7   : > { %404 = vst [vmem:[#allocation10 + $0x2] sm:$0x1] %v401_v18 }
 0x3a8 PF: > { %p630_p3 = scmp.eq.s32.totalorder %s969_s0, 2  ;;  %s910_s16 = smov [#allocation10]  }
 0x3a9   : > { %s411_s7 = sshll.u32 %s910_s16, 4  ;;  %s412_s7 = int_to_ptr.vmem [resolvable:$true] %s411_s7 }
 0x3aa   : > { %s822_s19 = scalar_lea.vmem %s412_s7, 48  ;;  %s828_s17 = scalar_lea.vmem %s412_s7, 64 }
 0x3ab   : > { %p823_p4 = scmp.ne.s32.totalorder %s412_s7, %s822_s19  ;;  %p829_p5 = scmp.lt.s32.totalorder %s412_s7, %s412_s7 }
 0x3ac   : > { %p830_p6 = scmp.lt.s32.totalorder %s828_s17, %s822_s19 }
 0x3ad   : > { %p824_p13 = pnand %p823_p4, %p630_p3 }
 0x3ae   : > { %p831_p11 = por %p830_p6, %p829_p5 }
 0x3af   : > { %p825_p1 = pneg %p824_p13 }
 0x3b1   : > { %p832_p10 = pnand %p831_p11, %p825_p1 }
 0x3b3   : > { %835 = shalt.err (!%p832_p10)
}
 0x3b4   : > { %s836_s5 = scalar_lea.hbm %s1189_s4, 48 }
 0x3b5   : > { %p837_p7 = scmp.ne.s32.totalorder %s1189_s4, %s836_s5  ;;  %p842_p12 = scmp.lt.u32.totalorder %s836_s5, %s1189_s4 }
 0x3b7   : > { %p838_p8 = pnand %p837_p7, %p630_p3 }
 0x3b9   : > { %p839_p9 = pneg %p838_p8 }
 0x3bb   : > { %p844_p0 = pnand %p842_p12, %p839_p9 }
 0x3bd   : > { %847 = shalt.err (!%p844_p0)
}
 0x3be   : > { %s911_s15 = smov 16   ;;  %s912_s11 = smov 1  }
 0x3bf   : > { %622 = dma.vmem_to_hbm [thread:$0]  (%p630_p3), %s412_s7, 48, %s1189_s4, [#allocation9], %s911_s15, %s911_s15, %s912_s11  }
 0x3c0   : > { %879 = dma.done.wait (%p630_p3), [#allocation9], 48  }
 0x3c1   : > { %881 = vsyncadd (%p630_p3), [#allocation9], 4294967248 }
 0x3c2 PF: > { %p19_p2 = scmp.ge.s32.totalorder %s972_s29, 5   ;;  %s1193_s25 = smov %s888_s26 }
 0x3c3   : > { %s1194_s26 = smov %s892_s27  ;;  %s1195_s27 = smov %s982_s6 }
 0x3c4   : > { %s1196_s28 = smov %s972_s29  ;;  %21 = sbr.rel (!%p19_p2) target bundleno = 16 (0x10), region = 106 }
 0x3cb   :  { %427 = vsyncpa [#allocation8], 1 }
 0x3cc   :  { %429 = vsyncpa [#allocation8 + $0x1], 1 }
 0x3cd   :  { %430 = vsyncpa [#allocation9], 1 }
 0x3ce   :  { %432 = vsyncpa [#allocation9 + $0x1], 1 }
 0x3cf   :  { %433 = vsyncmov [#allocation4] }
 0x3d2   :  { %s434_s0 = vpop.sfrf %433 }
 0x3d3   :  { %p530_p3 = scmp.ne.s32.totalorder %s434_s0, 0 }
 0x3d5   :  { %438 = shalt.err (%p530_p3)  }
 0x3d6   :  { %440 = vsyncmov [#allocation4 + $0x1] }
 0x3d9   :  { %s441_s21 = vpop.sfrf %440 }
 0x3da   :  { %p531_p4 = scmp.ne.s32.totalorder %s441_s21, 0 }
 0x3dc   :  { %445 = shalt.err (%p531_p4)  }
 0x3dd   :  { %447 = vsyncmov [#allocation4 + $0x2] }
 0x3e0   :  { %s448_s20 = vpop.sfrf %447 }
 0x3e1   :  { %p532_p13 = scmp.ne.s32.totalorder %s448_s20, 0 }
 0x3e3   :  { %452 = shalt.err (%p532_p13)  }
 0x3e4   :  { %454 = vsyncmov [#allocation4 + $0x3] }
 0x3e7   :  { %s455_s6 = vpop.sfrf %454 }
 0x3e8   :  { %p533_p1 = scmp.ne.s32.totalorder %s455_s6, 0 }
 0x3ea   :  { %459 = shalt.err (%p533_p1)  }

</bundles_post_ra>
